<compile_context>
chip_gen: v7x
topology: tpu7x:2x2x1
jax: 0.10.0
libtpu: 0.0.40
codegen_flags: <defaults>
</compile_context>

<pallas_src>
import functools

import jax
import jax.numpy as jnp
from jax.experimental import pallas as pl
from jax.experimental.pallas import tpu as pltpu


def _gather_kernel(ids_smem, table_hbm, out_ref, sem, *, tm):
    """One grid step: gather `tm` embedding rows from the HBM table.

    ids_smem : (N_pad,) int32  SMEM  (scalar-prefetched, full id array)
    table_hbm: (V, D)  float32 HBM   (memory_space=pl.ANY, never fully copied)
    out_ref  : (tm, D) float32 VMEM  (lane-dense output tile)
    sem      : (tm,) DMA semaphores, one per in-flight row copy
    """
    base = pl.program_id(0) * tm

    # Issue all row DMAs for this tile; they overlap each other in the DMA
    # engine (and with the previous tile's output writeback).
    @pl.loop(0, tm)
    def _(t):
        tok = ids_smem[base + t]
        pltpu.make_async_copy(
            table_hbm.at[pl.ds(tok, 1), :],
            out_ref.at[pl.ds(t, 1), :],
            sem.at[t],
        ).start()

    # Wait for every row copy of this tile before the block is written back.
    @pl.loop(0, tm)
    def _(t):
        pltpu.make_async_copy(
            table_hbm.at[pl.ds(0, 1), :],
            out_ref.at[pl.ds(t, 1), :],
            sem.at[t],
        ).wait()


def frozen_word2vec_forward(input_ids, table, *, tm=128):
    """input_ids: (B, S) int; table: (V, D) float32 -> (B, S, D) float32."""
    B, S = input_ids.shape
    V, D = table.shape
    N = B * S
    n_pad = pl.cdiv(N, tm) * tm

    ids = input_ids.reshape(N).astype(jnp.int32)
    # nn.Embedding would raise on out-of-range ids; we clamp so the row DMA
    # stays in bounds. TODO(synk): no in-kernel OOB id check (assumes valid ids).
    ids = jnp.clip(ids, 0, V - 1)
    # Pad the token stream with the pad token (row 0); sliced off below.
    ids = jnp.pad(ids, (0, n_pad - N))

    kernel = functools.partial(_gather_kernel, tm=tm)

    # Memory-bound gather: read N*D*4 from the table, write N*D*4, read ids.
    cost = pl.CostEstimate(
        flops=0,
        transcendentals=0,
        bytes_accessed=2 * n_pad * D * 4 + n_pad * 4,
    )

    out = pl.pallas_call(
        kernel,
        out_shape=jax.ShapeDtypeStruct((n_pad, D), table.dtype),
        grid_spec=pltpu.PrefetchScalarGridSpec(
            num_scalar_prefetch=1,              # ids -> SMEM before the grid runs
            grid=(n_pad // tm,),
            in_specs=[
                pl.BlockSpec(memory_space=pl.ANY),   # frozen table stays in HBM
            ],
            out_specs=pl.BlockSpec((tm, D), lambda i, ids_ref: (i, 0)),
            scratch_shapes=[pltpu.SemaphoreType.DMA((tm,))],
        ),
        compiler_params=pltpu.CompilerParams(
            dimension_semantics=("arbitrary",),
        ),
        cost_estimate=cost,
    )(ids, table)

    return out[:N].reshape(B, S, D)


def build_frozen_table(key, vocab_size, embedding_dim):
    """Deterministic stand-in for the gensim KeyedVectors + pad row.

    Row 0 is the zero padding vector (padding_idx=0); rows 1..V-1 are the
    'pre-trained' word vectors.
    """
    word_vectors = jax.random.normal(
        key, (vocab_size - 1, embedding_dim), dtype=jnp.float32
    )
    pad_vector = jnp.zeros((1, embedding_dim), dtype=jnp.float32)
    return jnp.concatenate([pad_vector, word_vectors], axis=0)


if __name__ == "__main__":
    key = jax.random.PRNGKey(0)
    k_table, k_ids, k_ids2 = jax.random.split(key, 3)

    # Small, module-consistent shapes: batch=2, seq=8, vocab=64 (incl. pad), dim=128.
    B, S, V, D = 2, 8, 64, 128
    table = build_frozen_table(k_table, V, D)            # (V, D), row 0 == 0
    input_ids = jax.random.randint(k_ids, (B, S), 0, V, dtype=jnp.int32)
    # Force a couple of padding tokens to exercise the zero pad row.
    input_ids = input_ids.at[0, 0].set(0).at[1, -1].set(0)

    out = frozen_word2vec_forward(input_ids, table)
    out = jax.block_until_ready(out)

    ref = jnp.take(table, input_ids, axis=0)
    assert out.shape == (B, S, D)
    assert jnp.allclose(out, ref, atol=1e-5, rtol=1e-5)

    # Second sanity check: N not divisible by the token tile and grid > 1
    # (exercises padding + multi-tile addressing).
    B2, S2 = 3, 100                                      # N=300 -> padded to 384, grid=3
    input_ids2 = jax.random.randint(k_ids2, (B2, S2), 0, V, dtype=jnp.int32)
    out2 = jax.block_until_ready(frozen_word2vec_forward(input_ids2, table))
    ref2 = jnp.take(table, input_ids2, axis=0)
    assert out2.shape == (B2, S2, D)
    assert jnp.allclose(out2, ref2, atol=1e-5, rtol=1e-5)

    print("KERNEL_OK")
</pallas_src>

<mosaic_0001>
module attributes {stable_mosaic.version = 11 : i64} {
  func.func @_gather_kernel(%arg0: i32, %arg1: memref<128xi32, #tpu.memory_space<smem>>, %arg2: memref<64x128xf32, #tpu.memory_space<any>>, %arg3: memref<128x128xf32, #tpu.memory_space<vmem>>, %arg4: memref<128x!tpu.dma_semaphore, #tpu.memory_space<semaphore_mem>>) attributes {dimension_semantics = [#tpu.dimension_semantics<arbitrary>], iteration_bounds = array<i64: 1>, scalar_prefetch = 1 : i64, scratch_operands = 1 : i64, tpu.core_type = #tpu.core_type<tc>, window_params = [{}, {transform_indices = @transform_1, window_bounds = array<i64: 128, 128>}]} {
    %c128_i32 = arith.constant 128 : i32
    %0 = arith.muli %arg0, %c128_i32 : i32
    %c0_i32 = arith.constant 0 : i32
    %c128_i32_0 = arith.constant 128 : i32
    %1 = arith.addi %c0_i32, %c128_i32_0 : i32
    %c1_i32 = arith.constant 1 : i32
    scf.for %arg5 = %c0_i32 to %1 step %c1_i32  : i32 {
      %c1_i32_6 = arith.constant 1 : i32
      %3 = arith.muli %arg5, %c1_i32_6 : i32
      %c0_i32_7 = arith.constant 0 : i32
      %4 = arith.addi %c0_i32_7, %3 : i32
      %5 = arith.addi %0, %4 : i32
      %6 = arith.index_cast %5 : i32 to index
      %7 = memref.load %arg1[%6] : memref<128xi32, #tpu.memory_space<smem>>
      %c0_i32_8 = arith.constant 0 : i32
      %8 = tpu.memref_slice %arg2[%7, %c0_i32_8] : memref<64x128xf32, #tpu.memory_space<any>> -> memref<1x128xf32, #tpu.memory_space<any>>
      %c0_i32_9 = arith.constant 0 : i32
      %9 = tpu.memref_slice %arg3[%4, %c0_i32_9] : memref<128x128xf32, #tpu.memory_space<vmem>> -> memref<1x128xf32, #tpu.memory_space<vmem>>
      %10 = tpu.memref_slice %arg4[%4] : memref<128x!tpu.dma_semaphore, #tpu.memory_space<semaphore_mem>> -> memref<1x!tpu.dma_semaphore, #tpu.memory_space<semaphore_mem>>
      %11 = tpu.memref_squeeze %10 : memref<1x!tpu.dma_semaphore, #tpu.memory_space<semaphore_mem>> -> memref<!tpu.dma_semaphore, #tpu.memory_space<semaphore_mem>>
      tpu.enqueue_dma source(%8 : memref<1x128xf32, #tpu.memory_space<any>>) target(%9 : memref<1x128xf32, #tpu.memory_space<vmem>>) target_semaphore(%11 : memref<!tpu.dma_semaphore, #tpu.memory_space<semaphore_mem>>)
    }
    %c128_i32_1 = arith.constant 128 : i32
    %c0_i32_2 = arith.constant 0 : i32
    %c128_i32_3 = arith.constant 128 : i32
    %2 = arith.addi %c0_i32_2, %c128_i32_3 : i32
    %c1_i32_4 = arith.constant 1 : i32
    scf.for %arg5 = %c0_i32_2 to %2 step %c1_i32_4  : i32 {
      %c1_i32_6 = arith.constant 1 : i32
      %3 = arith.muli %arg5, %c1_i32_6 : i32
      %c0_i32_7 = arith.constant 0 : i32
      %4 = arith.addi %c0_i32_7, %3 : i32
      %c0_i32_8 = arith.constant 0 : i32
      %c0_i32_9 = arith.constant 0 : i32
      %5 = tpu.memref_slice %arg2[%c0_i32_8, %c0_i32_9] : memref<64x128xf32, #tpu.memory_space<any>> -> memref<1x128xf32, #tpu.memory_space<any>>
      %c0_i32_10 = arith.constant 0 : i32
      %6 = tpu.memref_slice %arg3[%4, %c0_i32_10] : memref<128x128xf32, #tpu.memory_space<vmem>> -> memref<1x128xf32, #tpu.memory_space<vmem>>
      %7 = tpu.memref_slice %arg4[%4] : memref<128x!tpu.dma_semaphore, #tpu.memory_space<semaphore_mem>> -> memref<1x!tpu.dma_semaphore, #tpu.memory_space<semaphore_mem>>
      %8 = tpu.memref_squeeze %7 : memref<1x!tpu.dma_semaphore, #tpu.memory_space<semaphore_mem>> -> memref<!tpu.dma_semaphore, #tpu.memory_space<semaphore_mem>>
      tpu.wait_dma2 semaphore(%8 : memref<!tpu.dma_semaphore, #tpu.memory_space<semaphore_mem>>) src(%5 : memref<1x128xf32, #tpu.memory_space<any>>) dst(%6 : memref<1x128xf32, #tpu.memory_space<vmem>>)
    }
    %c128_i32_5 = arith.constant 128 : i32
    return
  }
  func.func @transform_1(%arg0: i32, %arg1: memref<128xi32, #tpu.memory_space<smem>>) -> (i32, i32) {
    %c0_i32 = arith.constant 0 : i32
    %c0_i32_0 = arith.constant 0 : i32
    return %arg0, %c0_i32 : i32, i32
  }
}

</mosaic_0001>

<bundles_post_ra>
// kernel: tpu_custom_call.1
= control target key start
LH: loop header
LB: loop body
LE: loop exit
PB: predicated region body
PF: predicated region fallthrough
CT: control target
= control target key end

     0   :  { %s1270_s0 = inlined_call_operand.hbm [shape: s32[128], index: 0, kind: input, shape index: {}]   ;;  %s1271_s1 = inlined_call_operand.hbm [shape: f32[64,128], index: 1, kind: input, shape index: {}]   ;;  %s1272_s2 = inlined_call_operand.hbm [shape: f32[128,128], index: 2, kind: output, shape index: {}]  }
   0x1   :  { %s1121_s11 = scalar_lea.hbm %s1270_s0, 16 }
   0x2   :  { %p1122_p0 = scmp.ne.s32.totalorder %s1270_s0, %s1121_s11  ;;  %p1125_p1 = scmp.lt.u32.totalorder %s1121_s11, %s1270_s0 }
   0x4   :  { %p1127_p2 = pnand %p1125_p1, %p1122_p0 }
   0x6   :  { %1130 = shalt.err (!%p1127_p2)  }
   0x7   :  { %s1199_s16 = smov [#allocation4]  }
   0x8   :  { %8 = dma.hbm_to_smem %s1270_s0, 16, %s1199_s16, [#allocation3] }
   0x9   :  { %1185 = dma.done.wait [#allocation3], 16 }
   0xa   :  { %1186 = vsyncadd [#allocation3], 4294967280 }
   0xb   :  { %10 = sfence }
   0xc   :  { %11 = vsyncpa [#allocation6], 0  ;;  %s1230_s19 = smov 0  }
   0xd LB: > { %s20_s20 = sld [smem:[#allocation4 + %s1193_s19]]  ;;  %s23_s21 = scalar_lea.vmem [#allocation5], %s1193_s19  ;;  %s1193_s19 = sphi %s1230_s19, %s18_s19  }
   0xe   : > { %s32_s22 = sshll.u32 %s23_s21, 4  ;;  %s24_s26 = scalar_lea.sflag [#allocation2], %s1193_s19  ;;  %s33_s22 = int_to_ptr.vmem [resolvable:$true] %s32_s22 }
   0xf   : > { %s1133_s30 = scalar_lea.hbm %s1271_s1, 1024 }
  0x13   : > { %s972_s23 = sshll.u32 %s20_s20, 4 }
  0x14   : > { %s22_s25 = scalar_lea.hbm %s1271_s1, %s972_s23 }
  0x15   : > { %s1131_s27 = scalar_lea.hbm %s22_s25, 16  ;;  %p1134_p4 = scmp.lt.u32.totalorder %s22_s25, %s1271_s1 }
  0x16   : > { %p1132_p3 = scmp.ne.s32.totalorder %s22_s25, %s1131_s27  ;;  %p1135_p5 = scmp.lt.u32.totalorder %s1133_s30, %s1131_s27 }
  0x17   : > { %p1137_p7 = scmp.lt.u32.totalorder %s1131_s27, %s22_s25 }
  0x18   : > { %p1136_p6 = por %p1135_p5, %p1134_p4 }
  0x1a   : > { %p1138_p8 = por %p1137_p7, %p1136_p6 }
  0x1c   : > { %p1139_p9 = pnand %p1138_p8, %p1132_p3 }
  0x1e   : > { %1142 = shalt.err (!%p1139_p9)  }
  0x1f   : > { %s1143_s5 = scalar_lea.vmem %s33_s22, 16  ;;  %s1200_s6 = smov [#allocation5]  }
  0x20   : > { %p1144_p10 = scmp.ne.s32.totalorder %s33_s22, %s1143_s5  ;;  %s1145_s7 = sshll.u32 %s1200_s6, 4  ;;  %s1247_s7 = int_to_ptr.vmem [resolvable:$false] %s1145_s7 }
  0x21   : > { %s1147_s8 = scalar_lea.vmem %s1247_s7, 2048  ;;  %p1148_p11 = scmp.lt.s32.totalorder %s33_s22, %s1247_s7 }
  0x22   : > { %p1149_p12 = scmp.lt.s32.totalorder %s1147_s8, %s1143_s5 }
  0x24   : > { %p1150_p13 = por %p1149_p12, %p1148_p11 }
  0x26   : > { %p1151_p0 = pnand %p1150_p13, %p1144_p10 }
  0x28   : > { %1154 = shalt.err (!%p1151_p0)  }
  0x29   : > { %35 = dma.hbm_to_vmem [thread:$0]  %s22_s25, 16, %s33_s22, %s24_s26 }
  0x2a   : > { %s18_s19 = sadd.s32 1, %s1193_s19  }
  0x2b   : > { %p15_p1 = scmp.ge.s32.totalorder %s18_s19, 128  }
  0x2c   :  { %s1195_s9 = smov (%p15_p1), 0  }
  0x2d   :  { %17 = sbr.rel (!%p15_p1) target bundleno = 13 (0xd), region = 169 }
  0x34 LB: > { %s42_s10 = scalar_lea.sflag [#allocation2], %s1197_s9  ;;  %s1197_s9 = sphi %s1195_s9, %s41_s9  }
  0x35   : > { %1187 = dma.done.wait %s42_s10, 16 }
  0x36   : > { %1188 = vsyncadd %s42_s10, 4294967280  ;;  %s41_s9 = sadd.s32 1, %s1197_s9  }
  0x37   : > { %p38_p2 = scmp.ge.s32.totalorder %s41_s9, 128  }
  0x38   :  { %p1156_p3 = scmp.ne.s32.totalorder (%p38_p2), %s1247_s7, %s1147_s8  ;;  %p1160_p4 = scmp.lt.s32.totalorder (%p38_p2), %s1247_s7, %s1247_s7 }
  0x39   :  { %40 = sbr.rel (!%p38_p2) target bundleno = 52 (0x34), region = 180  ;;  %p1161_p5 = scmp.lt.s32.totalorder (%p38_p2), %s1147_s8, %s1147_s8 }
  0x3b   :  { %p1162_p6 = por (%p38_p2), %p1161_p5, %p1160_p4 }
  0x3d   :  { %p1163_p7 = pnand (%p38_p2), %p1162_p6, %p1156_p3 }
  0x40   :  { %1166 = shalt.err (!%p1163_p7)
}
  0x41   :  { %s1167_s12 = scalar_lea.hbm %s1272_s2, 2048 }
  0x42   :  { %p1168_p8 = scmp.ne.s32.totalorder %s1272_s2, %s1167_s12  ;;  %p1171_p9 = scmp.lt.u32.totalorder %s1167_s12, %s1272_s2 }
  0x44   :  { %p1173_p10 = pnand %p1171_p9, %p1168_p8 }
  0x46   :  { %1176 = shalt.err (!%p1173_p10)
}
  0x47   :  { %s1201_s17 = smov 128   ;;  %s1202_s18 = smov 8  }
  0x48   :  { %57 = dma.vmem_to_hbm [thread:$0]  %s1247_s7, 2048, %s1272_s2, [#allocation6], %s1201_s17, %s1201_s17, %s1202_s18  }
  0x49   :  { %1189 = dma.done.wait [#allocation6], 2048  }
  0x4a   :  { %1190 = vsyncadd [#allocation6], 4294965248 }
  0x4b   :  { %61 = vsyncpa [#allocation6], 1 }
  0x4c   :  { %62 = vsyncmov [#allocation2] }
  0x4f   :  { %s63_s21 = vpop.sfrf %62 }
  0x50   :  { %p973_p11 = scmp.ne.s32.totalorder %s63_s21, 0 }
  0x52   :  { %67 = shalt.err (%p973_p11)  }
  0x53   :  { %69 = vsyncmov [#allocation2 + $0x1] }
  0x56   :  { %s70_s22 = vpop.sfrf %69 }
  0x57   :  { %p974_p12 = scmp.ne.s32.totalorder %s70_s22, 0 }
  0x59   :  { %74 = shalt.err (%p974_p12)  }
  0x5a   :  { %76 = vsyncmov [#allocation2 + $0x2] }
  0x5d   :  { %s77_s23 = vpop.sfrf %76 }
  0x5e   :  { %p975_p13 = scmp.ne.s32.totalorder %s77_s23, 0 }
  0x60   :  { %81 = shalt.err (%p975_p13)  }
  0x61   :  { %83 = vsyncmov [#allocation2 + $0x3] }
  0x64   :  { %s84_s0 = vpop.sfrf %83 }
  0x65   :  { %p976_p0 = scmp.ne.s32.totalorder %s84_s0, 0 }
  0x67   :  { %88 = shalt.err (%p976_p0)  }
  0x68   :  { %90 = vsyncmov [#allocation2 + $0x4] }
  0x6b   :  { %s91_s2 = vpop.sfrf %90 }
  0x6c   :  { %p977_p1 = scmp.ne.s32.totalorder %s91_s2, 0 }
  0x6e   :  { %95 = shalt.err (%p977_p1)  }
  0x6f   :  { %97 = vsyncmov [#allocation2 + $0x5] }
  0x72   :  { %s98_s24 = vpop.sfrf %97 }
  0x73   :  { %p978_p2 = scmp.ne.s32.totalorder %s98_s24, 0 }
  0x75   :  { %102 = shalt.err (%p978_p2)  }
  0x76   :  { %104 = vsyncmov [#allocation2 + $0x6] }
  0x79   :  { %s105_s25 = vpop.sfrf %104 }
  0x7a   :  { %p979_p3 = scmp.ne.s32.totalorder %s105_s25, 0 }
  0x7c   :  { %109 = shalt.err (%p979_p3)  }
  0x7d   :  { %111 = vsyncmov [#allocation2 + $0x7] }
  0x80   :  { %s112_s26 = vpop.sfrf %111 }
  0x81   :  { %p980_p4 = scmp.ne.s32.totalorder %s112_s26, 0 }
  0x83   :  { %116 = shalt.err (%p980_p4)  }
  0x84   :  { %118 = vsyncmov [#allocation2 + $0x8] }
  0x87   :  { %s119_s27 = vpop.sfrf %118 }
  0x88   :  { %p981_p5 = scmp.ne.s32.totalorder %s119_s27, 0 }
  0x8a   :  { %123 = shalt.err (%p981_p5)  }
  0x8b   :  { %125 = vsyncmov [#allocation2 + $0x9] }
  0x8e   :  { %s126_s28 = vpop.sfrf %125 }
  0x8f   :  { %p982_p6 = scmp.ne.s32.totalorder %s126_s28, 0 }
  0x91   :  { %130 = shalt.err (%p982_p6)  }
  0x92   :  { %132 = vsyncmov [#allocation2 + $0xa] }
  0x95   :  { %s133_s29 = vpop.sfrf %132 }
  0x96   :  { %p983_p7 = scmp.ne.s32.totalorder %s133_s29, 0 }
  0x98   :  { %137 = shalt.err (%p983_p7)  }
  0x99   :  { %139 = vsyncmov [#allocation2 + $0xb] }
  0x9c   :  { %s140_s30 = vpop.sfrf %139 }
  0x9d   :  { %p984_p8 = scmp.ne.s32.totalorder %s140_s30, 0 }
  0x9f   :  { %144 = shalt.err (%p984_p8)  }
  0xa0   :  { %146 = vsyncmov [#allocation2 + $0xc] }
  0xa3   :  { %s147_s3 = vpop.sfrf %146 }
  0xa4   :  { %p985_p9 = scmp.ne.s32.totalorder %s147_s3, 0 }
  0xa6   :  { %151 = shalt.err (%p985_p9)  }
  0xa7   :  { %153 = vsyncmov [#allocation2 + $0xd] }
  0xaa   :  { %s154_s4 = vpop.sfrf %153 }
  0xab   :  { %p986_p10 = scmp.ne.s32.totalorder %s154_s4, 0 }
  0xad   :  { %158 = shalt.err (%p986_p10)  }
  0xae   :  { %160 = vsyncmov [#allocation2 + $0xe] }
  0xb1   :  { %s161_s5 = vpop.sfrf %160 }
  0xb2   :  { %p987_p11 = scmp.ne.s32.totalorder %s161_s5, 0 }
  0xb4   :  { %165 = shalt.err (%p987_p11)  }
  0xb5   :  { %167 = vsyncmov [#allocation2 + $0xf] }
  0xb8   :  { %s168_s6 = vpop.sfrf %167 }
  0xb9   :  { %p988_p12 = scmp.ne.s32.totalorder %s168_s6, 0 }
  0xbb   :  { %172 = shalt.err (%p988_p12)  }
  0xbc   :  { %174 = vsyncmov [#allocation2 + $0x10] }
  0xbf   :  { %s175_s7 = vpop.sfrf %174 }
  0xc0   :  { %p989_p13 = scmp.ne.s32.totalorder %s175_s7, 0 }
  0xc2   :  { %179 = shalt.err (%p989_p13)  }
  0xc3   :  { %181 = vsyncmov [#allocation2 + $0x11] }
  0xc6   :  { %s182_s8 = vpop.sfrf %181 }
  0xc7   :  { %p990_p0 = scmp.ne.s32.totalorder %s182_s8, 0 }
  0xc9   :  { %186 = shalt.err (%p990_p0)  }
  0xca   :  { %188 = vsyncmov [#allocation2 + $0x12] }
  0xcd   :  { %s189_s9 = vpop.sfrf %188 }
  0xce   :  { %p991_p1 = scmp.ne.s32.totalorder %s189_s9, 0 }
  0xd0   :  { %193 = shalt.err (%p991_p1)  }
  0xd1   :  { %195 = vsyncmov [#allocation2 + $0x13] }
  0xd4   :  { %s196_s10 = vpop.sfrf %195 }
  0xd5   :  { %p992_p2 = scmp.ne.s32.totalorder %s196_s10, 0 }
  0xd7   :  { %200 = shalt.err (%p992_p2)  }
  0xd8   :  { %202 = vsyncmov [#allocation2 + $0x14] }
  0xdb   :  { %s203_s1 = vpop.sfrf %202 }
  0xdc   :  { %p993_p3 = scmp.ne.s32.totalorder %s203_s1, 0 }
  0xde   :  { %207 = shalt.err (%p993_p3)  }
  0xdf   :  { %209 = vsyncmov [#allocation2 + $0x15] }
  0xe2   :  { %s210_s11 = vpop.sfrf %209 }
  0xe3   :  { %p994_p4 = scmp.ne.s32.totalorder %s210_s11, 0 }
  0xe5   :  { %214 = shalt.err (%p994_p4)  }
  0xe6   :  { %216 = vsyncmov [#allocation2 + $0x16] }
  0xe9   :  { %s217_s12 = vpop.sfrf %216 }
  0xea   :  { %p995_p5 = scmp.ne.s32.totalorder %s217_s12, 0 }
  0xec   :  { %221 = shalt.err (%p995_p5)  }
  0xed   :  { %223 = vsyncmov [#allocation2 + $0x17] }
  0xf0   :  { %s224_s13 = vpop.sfrf %223 }
  0xf1   :  { %p996_p6 = scmp.ne.s32.totalorder %s224_s13, 0 }
  0xf3   :  { %228 = shalt.err (%p996_p6)  }
  0xf4   :  { %230 = vsyncmov [#allocation2 + $0x18] }
  0xf7   :  { %s231_s14 = vpop.sfrf %230 }
  0xf8   :  { %p997_p7 = scmp.ne.s32.totalorder %s231_s14, 0 }
  0xfa   :  { %235 = shalt.err (%p997_p7)  }
  0xfb   :  { %237 = vsyncmov [#allocation2 + $0x19] }
  0xfe   :  { %s238_s15 = vpop.sfrf %237 }
  0xff   :  { %p998_p8 = scmp.ne.s32.totalorder %s238_s15, 0 }
 0x101   :  { %242 = shalt.err (%p998_p8)  }
 0x102   :  { %244 = vsyncmov [#allocation2 + $0x1a] }
 0x105   :  { %s245_s16 = vpop.sfrf %244 }
 0x106   :  { %p999_p9 = scmp.ne.s32.totalorder %s245_s16, 0 }
 0x108   :  { %249 = shalt.err (%p999_p9)  }
 0x109   :  { %251 = vsyncmov [#allocation2 + $0x1b] }
 0x10c   :  { %s252_s17 = vpop.sfrf %251 }
 0x10d   :  { %p1000_p10 = scmp.ne.s32.totalorder %s252_s17, 0 }
 0x10f   :  { %256 = shalt.err (%p1000_p10)  }
 0x110   :  { %258 = vsyncmov [#allocation2 + $0x1c] }
 0x113   :  { %s259_s18 = vpop.sfrf %258 }
 0x114   :  { %p1001_p11 = scmp.ne.s32.totalorder %s259_s18, 0 }
 0x116   :  { %263 = shalt.err (%p1001_p11)  }
 0x117   :  { %265 = vsyncmov [#allocation2 + $0x1d] }
 0x11a   :  { %s266_s19 = vpop.sfrf %265 }
 0x11b   :  { %p1002_p12 = scmp.ne.s32.totalorder %s266_s19, 0 }
 0x11d   :  { %270 = shalt.err (%p1002_p12)  }
 0x11e   :  { %272 = vsyncmov [#allocation2 + $0x1e] }
 0x121   :  { %s273_s20 = vpop.sfrf %272 }
 0x122   :  { %p1003_p13 = scmp.ne.s32.totalorder %s273_s20, 0 }
 0x124   :  { %277 = shalt.err (%p1003_p13)  }
 0x125   :  { %279 = vsyncmov [#allocation2 + $0x1f] }
 0x128   :  { %s280_s21 = vpop.sfrf %279 }
 0x129   :  { %p1004_p0 = scmp.ne.s32.totalorder %s280_s21, 0 }
 0x12b   :  { %284 = shalt.err (%p1004_p0)  }
 0x12c   :  { %286 = vsyncmov [#allocation2 + $0x20] }
 0x12f   :  { %s287_s22 = vpop.sfrf %286 }
 0x130   :  { %p1005_p1 = scmp.ne.s32.totalorder %s287_s22, 0 }
 0x132   :  { %291 = shalt.err (%p1005_p1)  }
 0x133   :  { %293 = vsyncmov [#allocation2 + $0x21] }
 0x136   :  { %s294_s23 = vpop.sfrf %293 }
 0x137   :  { %p1006_p2 = scmp.ne.s32.totalorder %s294_s23, 0 }
 0x139   :  { %298 = shalt.err (%p1006_p2)  }
 0x13a   :  { %300 = vsyncmov [#allocation2 + $0x22] }
 0x13d   :  { %s301_s0 = vpop.sfrf %300 }
 0x13e   :  { %p1007_p3 = scmp.ne.s32.totalorder %s301_s0, 0 }
 0x140   :  { %305 = shalt.err (%p1007_p3)  }
 0x141   :  { %307 = vsyncmov [#allocation2 + $0x23] }
 0x144   :  { %s308_s2 = vpop.sfrf %307 }
 0x145   :  { %p1008_p4 = scmp.ne.s32.totalorder %s308_s2, 0 }
 0x147   :  { %312 = shalt.err (%p1008_p4)  }
 0x148   :  { %314 = vsyncmov [#allocation2 + $0x24] }
 0x14b   :  { %s315_s24 = vpop.sfrf %314 }
 0x14c   :  { %p1009_p5 = scmp.ne.s32.totalorder %s315_s24, 0 }
 0x14e   :  { %319 = shalt.err (%p1009_p5)  }
 0x14f   :  { %321 = vsyncmov [#allocation2 + $0x25] }
 0x152   :  { %s322_s25 = vpop.sfrf %321 }
 0x153   :  { %p1010_p6 = scmp.ne.s32.totalorder %s322_s25, 0 }
 0x155   :  { %326 = shalt.err (%p1010_p6)  }
 0x156   :  { %328 = vsyncmov [#allocation2 + $0x26] }
 0x159   :  { %s329_s26 = vpop.sfrf %328 }
 0x15a   :  { %p1011_p7 = scmp.ne.s32.totalorder %s329_s26, 0 }
 0x15c   :  { %333 = shalt.err (%p1011_p7)  }
 0x15d   :  { %335 = vsyncmov [#allocation2 + $0x27] }
 0x160   :  { %s336_s27 = vpop.sfrf %335 }
 0x161   :  { %p1012_p8 = scmp.ne.s32.totalorder %s336_s27, 0 }
 0x163   :  { %340 = shalt.err (%p1012_p8)  }
 0x164   :  { %342 = vsyncmov [#allocation2 + $0x28] }
 0x167   :  { %s343_s28 = vpop.sfrf %342 }
 0x168   :  { %p1013_p9 = scmp.ne.s32.totalorder %s343_s28, 0 }
 0x16a   :  { %347 = shalt.err (%p1013_p9)  }
 0x16b   :  { %349 = vsyncmov [#allocation2 + $0x29] }
 0x16e   :  { %s350_s29 = vpop.sfrf %349 }
 0x16f   :  { %p1014_p10 = scmp.ne.s32.totalorder %s350_s29, 0 }
 0x171   :  { %354 = shalt.err (%p1014_p10)  }
 0x172   :  { %356 = vsyncmov [#allocation2 + $0x2a] }
 0x175   :  { %s357_s30 = vpop.sfrf %356 }
 0x176   :  { %p1015_p11 = scmp.ne.s32.totalorder %s357_s30, 0 }
 0x178   :  { %361 = shalt.err (%p1015_p11)  }
 0x179   :  { %363 = vsyncmov [#allocation2 + $0x2b] }
 0x17c   :  { %s364_s3 = vpop.sfrf %363 }
 0x17d   :  { %p1016_p12 = scmp.ne.s32.totalorder %s364_s3, 0 }
 0x17f   :  { %368 = shalt.err (%p1016_p12)  }
 0x180   :  { %370 = vsyncmov [#allocation2 + $0x2c] }
 0x183   :  { %s371_s4 = vpop.sfrf %370 }
 0x184   :  { %p1017_p13 = scmp.ne.s32.totalorder %s371_s4, 0 }
 0x186   :  { %375 = shalt.err (%p1017_p13)  }
 0x187   :  { %377 = vsyncmov [#allocation2 + $0x2d] }
 0x18a   :  { %s378_s5 = vpop.sfrf %377 }
 0x18b   :  { %p1018_p0 = scmp.ne.s32.totalorder %s378_s5, 0 }
 0x18d   :  { %382 = shalt.err (%p1018_p0)  }
 0x18e   :  { %384 = vsyncmov [#allocation2 + $0x2e] }
 0x191   :  { %s385_s6 = vpop.sfrf %384 }
 0x192   :  { %p1019_p1 = scmp.ne.s32.totalorder %s385_s6, 0 }
 0x194   :  { %389 = shalt.err (%p1019_p1)  }
 0x195   :  { %391 = vsyncmov [#allocation2 + $0x2f] }
 0x198   :  { %s392_s7 = vpop.sfrf %391 }
 0x199   :  { %p1020_p2 = scmp.ne.s32.totalorder %s392_s7, 0 }
 0x19b   :  { %396 = shalt.err (%p1020_p2)  }
 0x19c   :  { %398 = vsyncmov [#allocation2 + $0x30] }
 0x19f   :  { %s399_s8 = vpop.sfrf %398 }
 0x1a0   :  { %p1021_p3 = scmp.ne.s32.totalorder %s399_s8, 0 }
 0x1a2   :  { %403 = shalt.err (%p1021_p3)  }
 0x1a3   :  { %405 = vsyncmov [#allocation2 + $0x31] }
 0x1a6   :  { %s406_s9 = vpop.sfrf %405 }
 0x1a7   :  { %p1022_p4 = scmp.ne.s32.totalorder %s406_s9, 0 }
 0x1a9   :  { %410 = shalt.err (%p1022_p4)  }
 0x1aa   :  { %412 = vsyncmov [#allocation2 + $0x32] }
 0x1ad   :  { %s413_s10 = vpop.sfrf %412 }
 0x1ae   :  { %p1023_p5 = scmp.ne.s32.totalorder %s413_s10, 0 }
 0x1b0   :  { %417 = shalt.err (%p1023_p5)  }
 0x1b1   :  { %419 = vsyncmov [#allocation2 + $0x33] }
 0x1b4   :  { %s420_s1 = vpop.sfrf %419 }
 0x1b5   :  { %p1024_p6 = scmp.ne.s32.totalorder %s420_s1, 0 }
 0x1b7   :  { %424 = shalt.err (%p1024_p6)  }
 0x1b8   :  { %426 = vsyncmov [#allocation2 + $0x34] }
 0x1bb   :  { %s427_s11 = vpop.sfrf %426 }
 0x1bc   :  { %p1025_p7 = scmp.ne.s32.totalorder %s427_s11, 0 }
 0x1be   :  { %431 = shalt.err (%p1025_p7)  }
 0x1bf   :  { %433 = vsyncmov [#allocation2 + $0x35] }
 0x1c2   :  { %s434_s12 = vpop.sfrf %433 }
 0x1c3   :  { %p1026_p8 = scmp.ne.s32.totalorder %s434_s12, 0 }
 0x1c5   :  { %438 = shalt.err (%p1026_p8)  }
 0x1c6   :  { %440 = vsyncmov [#allocation2 + $0x36] }
 0x1c9   :  { %s441_s13 = vpop.sfrf %440 }
 0x1ca   :  { %p1027_p9 = scmp.ne.s32.totalorder %s441_s13, 0 }
 0x1cc   :  { %445 = shalt.err (%p1027_p9)  }
 0x1cd   :  { %447 = vsyncmov [#allocation2 + $0x37] }
 0x1d0   :  { %s448_s14 = vpop.sfrf %447 }
 0x1d1   :  { %p1028_p10 = scmp.ne.s32.totalorder %s448_s14, 0 }
 0x1d3   :  { %452 = shalt.err (%p1028_p10)  }
 0x1d4   :  { %454 = vsyncmov [#allocation2 + $0x38] }
 0x1d7   :  { %s455_s15 = vpop.sfrf %454 }
 0x1d8   :  { %p1029_p11 = scmp.ne.s32.totalorder %s455_s15, 0 }
 0x1da   :  { %459 = shalt.err (%p1029_p11)  }
 0x1db   :  { %461 = vsyncmov [#allocation2 + $0x39] }
 0x1de   :  { %s462_s16 = vpop.sfrf %461 }
 0x1df   :  { %p1030_p12 = scmp.ne.s32.totalorder %s462_s16, 0 }
 0x1e1   :  { %466 = shalt.err (%p1030_p12)  }
 0x1e2   :  { %468 = vsyncmov [#allocation2 + $0x3a] }
 0x1e5   :  { %s469_s17 = vpop.sfrf %468 }
 0x1e6   :  { %p1031_p13 = scmp.ne.s32.totalorder %s469_s17, 0 }
 0x1e8   :  { %473 = shalt.err (%p1031_p13)  }
 0x1e9   :  { %475 = vsyncmov [#allocation2 + $0x3b] }
 0x1ec   :  { %s476_s18 = vpop.sfrf %475 }
 0x1ed   :  { %p1032_p0 = scmp.ne.s32.totalorder %s476_s18, 0 }
 0x1ef   :  { %480 = shalt.err (%p1032_p0)  }
 0x1f0   :  { %482 = vsyncmov [#allocation2 + $0x3c] }
 0x1f3   :  { %s483_s19 = vpop.sfrf %482 }
 0x1f4   :  { %p1033_p1 = scmp.ne.s32.totalorder %s483_s19, 0 }
 0x1f6   :  { %487 = shalt.err (%p1033_p1)  }
 0x1f7   :  { %489 = vsyncmov [#allocation2 + $0x3d] }
 0x1fa   :  { %s490_s20 = vpop.sfrf %489 }
 0x1fb   :  { %p1034_p2 = scmp.ne.s32.totalorder %s490_s20, 0 }
 0x1fd   :  { %494 = shalt.err (%p1034_p2)  }
 0x1fe   :  { %496 = vsyncmov [#allocation2 + $0x3e] }
 0x201   :  { %s497_s21 = vpop.sfrf %496 }
 0x202   :  { %p1035_p3 = scmp.ne.s32.totalorder %s497_s21, 0 }
 0x204   :  { %501 = shalt.err (%p1035_p3)  }
 0x205   :  { %503 = vsyncmov [#allocation2 + $0x3f] }
 0x208   :  { %s504_s22 = vpop.sfrf %503 }
 0x209   :  { %p1036_p4 = scmp.ne.s32.totalorder %s504_s22, 0 }
 0x20b   :  { %508 = shalt.err (%p1036_p4)  }
 0x20c   :  { %510 = vsyncmov [#allocation2 + $0x40] }
 0x20f   :  { %s511_s23 = vpop.sfrf %510 }
 0x210   :  { %p1037_p5 = scmp.ne.s32.totalorder %s511_s23, 0 }
 0x212   :  { %515 = shalt.err (%p1037_p5)  }
 0x213   :  { %517 = vsyncmov [#allocation2 + $0x41] }
 0x216   :  { %s518_s0 = vpop.sfrf %517 }
 0x217   :  { %p1038_p6 = scmp.ne.s32.totalorder %s518_s0, 0 }
 0x219   :  { %522 = shalt.err (%p1038_p6)  }
 0x21a   :  { %524 = vsyncmov [#allocation2 + $0x42] }
 0x21d   :  { %s525_s2 = vpop.sfrf %524 }
 0x21e   :  { %p1039_p7 = scmp.ne.s32.totalorder %s525_s2, 0 }
 0x220   :  { %529 = shalt.err (%p1039_p7)  }
 0x221   :  { %531 = vsyncmov [#allocation2 + $0x43] }
 0x224   :  { %s532_s24 = vpop.sfrf %531 }
 0x225   :  { %p1040_p8 = scmp.ne.s32.totalorder %s532_s24, 0 }
 0x227   :  { %536 = shalt.err (%p1040_p8)  }
 0x228   :  { %538 = vsyncmov [#allocation2 + $0x44] }
 0x22b   :  { %s539_s25 = vpop.sfrf %538 }
 0x22c   :  { %p1041_p9 = scmp.ne.s32.totalorder %s539_s25, 0 }
 0x22e   :  { %543 = shalt.err (%p1041_p9)  }
 0x22f   :  { %545 = vsyncmov [#allocation2 + $0x45] }
 0x232   :  { %s546_s26 = vpop.sfrf %545 }
 0x233   :  { %p1042_p10 = scmp.ne.s32.totalorder %s546_s26, 0 }
 0x235   :  { %550 = shalt.err (%p1042_p10)  }
 0x236   :  { %552 = vsyncmov [#allocation2 + $0x46] }
 0x239   :  { %s553_s27 = vpop.sfrf %552 }
 0x23a   :  { %p1043_p11 = scmp.ne.s32.totalorder %s553_s27, 0 }
 0x23c   :  { %557 = shalt.err (%p1043_p11)  }
 0x23d   :  { %559 = vsyncmov [#allocation2 + $0x47] }
 0x240   :  { %s560_s28 = vpop.sfrf %559 }
 0x241   :  { %p1044_p12 = scmp.ne.s32.totalorder %s560_s28, 0 }
 0x243   :  { %564 = shalt.err (%p1044_p12)  }
 0x244   :  { %566 = vsyncmov [#allocation2 + $0x48] }
 0x247   :  { %s567_s29 = vpop.sfrf %566 }
 0x248   :  { %p1045_p13 = scmp.ne.s32.totalorder %s567_s29, 0 }
 0x24a   :  { %571 = shalt.err (%p1045_p13)  }
 0x24b   :  { %573 = vsyncmov [#allocation2 + $0x49] }
 0x24e   :  { %s574_s30 = vpop.sfrf %573 }
 0x24f   :  { %p1046_p0 = scmp.ne.s32.totalorder %s574_s30, 0 }
 0x251   :  { %578 = shalt.err (%p1046_p0)  }
 0x252   :  { %580 = vsyncmov [#allocation2 + $0x4a] }
 0x255   :  { %s581_s3 = vpop.sfrf %580 }
 0x256   :  { %p1047_p1 = scmp.ne.s32.totalorder %s581_s3, 0 }
 0x258   :  { %585 = shalt.err (%p1047_p1)  }
 0x259   :  { %587 = vsyncmov [#allocation2 + $0x4b] }
 0x25c   :  { %s588_s4 = vpop.sfrf %587 }
 0x25d   :  { %p1048_p2 = scmp.ne.s32.totalorder %s588_s4, 0 }
 0x25f   :  { %592 = shalt.err (%p1048_p2)  }
 0x260   :  { %594 = vsyncmov [#allocation2 + $0x4c] }
 0x263   :  { %s595_s5 = vpop.sfrf %594 }
 0x264   :  { %p1049_p3 = scmp.ne.s32.totalorder %s595_s5, 0 }
 0x266   :  { %599 = shalt.err (%p1049_p3)  }
 0x267   :  { %601 = vsyncmov [#allocation2 + $0x4d] }
 0x26a   :  { %s602_s6 = vpop.sfrf %601 }
 0x26b   :  { %p1050_p4 = scmp.ne.s32.totalorder %s602_s6, 0 }
 0x26d   :  { %606 = shalt.err (%p1050_p4)  }
 0x26e   :  { %608 = vsyncmov [#allocation2 + $0x4e] }
 0x271   :  { %s609_s7 = vpop.sfrf %608 }
 0x272   :  { %p1051_p5 = scmp.ne.s32.totalorder %s609_s7, 0 }
 0x274   :  { %613 = shalt.err (%p1051_p5)  }
 0x275   :  { %615 = vsyncmov [#allocation2 + $0x4f] }
 0x278   :  { %s616_s8 = vpop.sfrf %615 }
 0x279   :  { %p1052_p6 = scmp.ne.s32.totalorder %s616_s8, 0 }
 0x27b   :  { %620 = shalt.err (%p1052_p6)  }
 0x27c   :  { %622 = vsyncmov [#allocation2 + $0x50] }
 0x27f   :  { %s623_s9 = vpop.sfrf %622 }
 0x280   :  { %p1053_p7 = scmp.ne.s32.totalorder %s623_s9, 0 }
 0x282   :  { %627 = shalt.err (%p1053_p7)  }
 0x283   :  { %629 = vsyncmov [#allocation2 + $0x51] }
 0x286   :  { %s630_s10 = vpop.sfrf %629 }
 0x287   :  { %p1054_p8 = scmp.ne.s32.totalorder %s630_s10, 0 }
 0x289   :  { %634 = shalt.err (%p1054_p8)  }
 0x28a   :  { %636 = vsyncmov [#allocation2 + $0x52] }
 0x28d   :  { %s637_s1 = vpop.sfrf %636 }
 0x28e   :  { %p1055_p9 = scmp.ne.s32.totalorder %s637_s1, 0 }
 0x290   :  { %641 = shalt.err (%p1055_p9)  }
 0x291   :  { %643 = vsyncmov [#allocation2 + $0x53] }
 0x294   :  { %s644_s11 = vpop.sfrf %643 }
 0x295   :  { %p1056_p10 = scmp.ne.s32.totalorder %s644_s11, 0 }
 0x297   :  { %648 = shalt.err (%p1056_p10)  }
 0x298   :  { %650 = vsyncmov [#allocation2 + $0x54] }
 0x29b   :  { %s651_s12 = vpop.sfrf %650 }
 0x29c   :  { %p1057_p11 = scmp.ne.s32.totalorder %s651_s12, 0 }
 0x29e   :  { %655 = shalt.err (%p1057_p11)  }
 0x29f   :  { %657 = vsyncmov [#allocation2 + $0x55] }
 0x2a2   :  { %s658_s13 = vpop.sfrf %657 }
 0x2a3   :  { %p1058_p12 = scmp.ne.s32.totalorder %s658_s13, 0 }
 0x2a5   :  { %662 = shalt.err (%p1058_p12)  }
 0x2a6   :  { %664 = vsyncmov [#allocation2 + $0x56] }
 0x2a9   :  { %s665_s14 = vpop.sfrf %664 }
 0x2aa   :  { %p1059_p13 = scmp.ne.s32.totalorder %s665_s14, 0 }
 0x2ac   :  { %669 = shalt.err (%p1059_p13)  }
 0x2ad   :  { %671 = vsyncmov [#allocation2 + $0x57] }
 0x2b0   :  { %s672_s15 = vpop.sfrf %671 }
 0x2b1   :  { %p1060_p0 = scmp.ne.s32.totalorder %s672_s15, 0 }
 0x2b3   :  { %676 = shalt.err (%p1060_p0)  }
 0x2b4   :  { %678 = vsyncmov [#allocation2 + $0x58] }
 0x2b7   :  { %s679_s16 = vpop.sfrf %678 }
 0x2b8   :  { %p1061_p1 = scmp.ne.s32.totalorder %s679_s16, 0 }
 0x2ba   :  { %683 = shalt.err (%p1061_p1)  }
 0x2bb   :  { %685 = vsyncmov [#allocation2 + $0x59] }
 0x2be   :  { %s686_s17 = vpop.sfrf %685 }
 0x2bf   :  { %p1062_p2 = scmp.ne.s32.totalorder %s686_s17, 0 }
 0x2c1   :  { %690 = shalt.err (%p1062_p2)  }
 0x2c2   :  { %692 = vsyncmov [#allocation2 + $0x5a] }
 0x2c5   :  { %s693_s18 = vpop.sfrf %692 }
 0x2c6   :  { %p1063_p3 = scmp.ne.s32.totalorder %s693_s18, 0 }
 0x2c8   :  { %697 = shalt.err (%p1063_p3)  }
 0x2c9   :  { %699 = vsyncmov [#allocation2 + $0x5b] }
 0x2cc   :  { %s700_s19 = vpop.sfrf %699 }
 0x2cd   :  { %p1064_p4 = scmp.ne.s32.totalorder %s700_s19, 0 }
 0x2cf   :  { %704 = shalt.err (%p1064_p4)  }
 0x2d0   :  { %706 = vsyncmov [#allocation2 + $0x5c] }
 0x2d3   :  { %s707_s20 = vpop.sfrf %706 }
 0x2d4   :  { %p1065_p5 = scmp.ne.s32.totalorder %s707_s20, 0 }
 0x2d6   :  { %711 = shalt.err (%p1065_p5)  }
 0x2d7   :  { %713 = vsyncmov [#allocation2 + $0x5d] }
 0x2da   :  { %s714_s21 = vpop.sfrf %713 }
 0x2db   :  { %p1066_p6 = scmp.ne.s32.totalorder %s714_s21, 0 }
 0x2dd   :  { %718 = shalt.err (%p1066_p6)  }
 0x2de   :  { %720 = vsyncmov [#allocation2 + $0x5e] }
 0x2e1   :  { %s721_s22 = vpop.sfrf %720 }
 0x2e2   :  { %p1067_p7 = scmp.ne.s32.totalorder %s721_s22, 0 }
 0x2e4   :  { %725 = shalt.err (%p1067_p7)  }
 0x2e5   :  { %727 = vsyncmov [#allocation2 + $0x5f] }
 0x2e8   :  { %s728_s23 = vpop.sfrf %727 }
 0x2e9   :  { %p1068_p8 = scmp.ne.s32.totalorder %s728_s23, 0 }
 0x2eb   :  { %732 = shalt.err (%p1068_p8)  }
 0x2ec   :  { %734 = vsyncmov [#allocation2 + $0x60] }
 0x2ef   :  { %s735_s0 = vpop.sfrf %734 }
 0x2f0   :  { %p1069_p9 = scmp.ne.s32.totalorder %s735_s0, 0 }
 0x2f2   :  { %739 = shalt.err (%p1069_p9)  }
 0x2f3   :  { %741 = vsyncmov [#allocation2 + $0x61] }
 0x2f6   :  { %s742_s2 = vpop.sfrf %741 }
 0x2f7   :  { %p1070_p10 = scmp.ne.s32.totalorder %s742_s2, 0 }
 0x2f9   :  { %746 = shalt.err (%p1070_p10)  }
 0x2fa   :  { %748 = vsyncmov [#allocation2 + $0x62] }
 0x2fd   :  { %s749_s24 = vpop.sfrf %748 }
 0x2fe   :  { %p1071_p11 = scmp.ne.s32.totalorder %s749_s24, 0 }
 0x300   :  { %753 = shalt.err (%p1071_p11)  }
 0x301   :  { %755 = vsyncmov [#allocation2 + $0x63] }
 0x304   :  { %s756_s25 = vpop.sfrf %755 }
 0x305   :  { %p1072_p12 = scmp.ne.s32.totalorder %s756_s25, 0 }
 0x307   :  { %760 = shalt.err (%p1072_p12)  }
 0x308   :  { %762 = vsyncmov [#allocation2 + $0x64] }
 0x30b   :  { %s763_s26 = vpop.sfrf %762 }
 0x30c   :  { %p1073_p13 = scmp.ne.s32.totalorder %s763_s26, 0 }
 0x30e   :  { %767 = shalt.err (%p1073_p13)  }
 0x30f   :  { %769 = vsyncmov [#allocation2 + $0x65] }
 0x312   :  { %s770_s27 = vpop.sfrf %769 }
 0x313   :  { %p1074_p0 = scmp.ne.s32.totalorder %s770_s27, 0 }
 0x315   :  { %774 = shalt.err (%p1074_p0)  }
 0x316   :  { %776 = vsyncmov [#allocation2 + $0x66] }
 0x319   :  { %s777_s28 = vpop.sfrf %776 }
 0x31a   :  { %p1075_p1 = scmp.ne.s32.totalorder %s777_s28, 0 }
 0x31c   :  { %781 = shalt.err (%p1075_p1)  }
 0x31d   :  { %783 = vsyncmov [#allocation2 + $0x67] }
 0x320   :  { %s784_s29 = vpop.sfrf %783 }
 0x321   :  { %p1076_p2 = scmp.ne.s32.totalorder %s784_s29, 0 }
 0x323   :  { %788 = shalt.err (%p1076_p2)  }
 0x324   :  { %790 = vsyncmov [#allocation2 + $0x68] }
 0x327   :  { %s791_s30 = vpop.sfrf %790 }
 0x328   :  { %p1077_p3 = scmp.ne.s32.totalorder %s791_s30, 0 }
 0x32a   :  { %795 = shalt.err (%p1077_p3)  }
 0x32b   :  { %797 = vsyncmov [#allocation2 + $0x69] }
 0x32e   :  { %s798_s3 = vpop.sfrf %797 }
 0x32f   :  { %p1078_p4 = scmp.ne.s32.totalorder %s798_s3, 0 }
 0x331   :  { %802 = shalt.err (%p1078_p4)  }
 0x332   :  { %804 = vsyncmov [#allocation2 + $0x6a] }
 0x335   :  { %s805_s4 = vpop.sfrf %804 }
 0x336   :  { %p1079_p5 = scmp.ne.s32.totalorder %s805_s4, 0 }
 0x338   :  { %809 = shalt.err (%p1079_p5)  }
 0x339   :  { %811 = vsyncmov [#allocation2 + $0x6b] }
 0x33c   :  { %s812_s5 = vpop.sfrf %811 }
 0x33d   :  { %p1080_p6 = scmp.ne.s32.totalorder %s812_s5, 0 }
 0x33f   :  { %816 = shalt.err (%p1080_p6)  }
 0x340   :  { %818 = vsyncmov [#allocation2 + $0x6c] }
 0x343   :  { %s819_s6 = vpop.sfrf %818 }
 0x344   :  { %p1081_p7 = scmp.ne.s32.totalorder %s819_s6, 0 }
 0x346   :  { %823 = shalt.err (%p1081_p7)  }
 0x347   :  { %825 = vsyncmov [#allocation2 + $0x6d] }
 0x34a   :  { %s826_s7 = vpop.sfrf %825 }
 0x34b   :  { %p1082_p8 = scmp.ne.s32.totalorder %s826_s7, 0 }
 0x34d   :  { %830 = shalt.err (%p1082_p8)  }
 0x34e   :  { %832 = vsyncmov [#allocation2 + $0x6e] }
 0x351   :  { %s833_s8 = vpop.sfrf %832 }
 0x352   :  { %p1083_p9 = scmp.ne.s32.totalorder %s833_s8, 0 }
 0x354   :  { %837 = shalt.err (%p1083_p9)  }
 0x355   :  { %839 = vsyncmov [#allocation2 + $0x6f] }
 0x358   :  { %s840_s9 = vpop.sfrf %839 }
 0x359   :  { %p1084_p10 = scmp.ne.s32.totalorder %s840_s9, 0 }
 0x35b   :  { %844 = shalt.err (%p1084_p10)  }
 0x35c   :  { %846 = vsyncmov [#allocation2 + $0x70] }
 0x35f   :  { %s847_s10 = vpop.sfrf %846 }
 0x360   :  { %p1085_p11 = scmp.ne.s32.totalorder %s847_s10, 0 }
 0x362   :  { %851 = shalt.err (%p1085_p11)  }
 0x363   :  { %853 = vsyncmov [#allocation2 + $0x71] }
 0x366   :  { %s854_s1 = vpop.sfrf %853 }
 0x367   :  { %p1086_p12 = scmp.ne.s32.totalorder %s854_s1, 0 }
 0x369   :  { %858 = shalt.err (%p1086_p12)  }
 0x36a   :  { %860 = vsyncmov [#allocation2 + $0x72] }
 0x36d   :  { %s861_s11 = vpop.sfrf %860 }
 0x36e   :  { %p1087_p13 = scmp.ne.s32.totalorder %s861_s11, 0 }
 0x370   :  { %865 = shalt.err (%p1087_p13)  }
 0x371   :  { %867 = vsyncmov [#allocation2 + $0x73] }
 0x374   :  { %s868_s12 = vpop.sfrf %867 }
 0x375   :  { %p1088_p0 = scmp.ne.s32.totalorder %s868_s12, 0 }
 0x377   :  { %872 = shalt.err (%p1088_p0)  }
 0x378   :  { %874 = vsyncmov [#allocation2 + $0x74] }
 0x37b   :  { %s875_s13 = vpop.sfrf %874 }
 0x37c   :  { %p1089_p1 = scmp.ne.s32.totalorder %s875_s13, 0 }
 0x37e   :  { %879 = shalt.err (%p1089_p1)  }
 0x37f   :  { %881 = vsyncmov [#allocation2 + $0x75] }
 0x382   :  { %s882_s14 = vpop.sfrf %881 }
 0x383   :  { %p1090_p2 = scmp.ne.s32.totalorder %s882_s14, 0 }
 0x385   :  { %886 = shalt.err (%p1090_p2)  }
 0x386   :  { %888 = vsyncmov [#allocation2 + $0x76] }
 0x389   :  { %s889_s15 = vpop.sfrf %888 }
 0x38a   :  { %p1091_p3 = scmp.ne.s32.totalorder %s889_s15, 0 }
 0x38c   :  { %893 = shalt.err (%p1091_p3)  }
 0x38d   :  { %895 = vsyncmov [#allocation2 + $0x77] }
 0x390   :  { %s896_s16 = vpop.sfrf %895 }
 0x391   :  { %p1092_p4 = scmp.ne.s32.totalorder %s896_s16, 0 }
 0x393   :  { %900 = shalt.err (%p1092_p4)  }
 0x394   :  { %902 = vsyncmov [#allocation2 + $0x78] }
 0x397   :  { %s903_s17 = vpop.sfrf %902 }
 0x398   :  { %p1093_p5 = scmp.ne.s32.totalorder %s903_s17, 0 }
 0x39a   :  { %907 = shalt.err (%p1093_p5)  }
 0x39b   :  { %909 = vsyncmov [#allocation2 + $0x79] }
 0x39e   :  { %s910_s18 = vpop.sfrf %909 }
 0x39f   :  { %p1094_p6 = scmp.ne.s32.totalorder %s910_s18, 0 }
 0x3a1   :  { %914 = shalt.err (%p1094_p6)  }
 0x3a2   :  { %916 = vsyncmov [#allocation2 + $0x7a] }
 0x3a5   :  { %s917_s19 = vpop.sfrf %916 }
 0x3a6   :  { %p1095_p7 = scmp.ne.s32.totalorder %s917_s19, 0 }
 0x3a8   :  { %921 = shalt.err (%p1095_p7)  }
 0x3a9   :  { %923 = vsyncmov [#allocation2 + $0x7b] }
 0x3ac   :  { %s924_s20 = vpop.sfrf %923 }
 0x3ad   :  { %p1096_p8 = scmp.ne.s32.totalorder %s924_s20, 0 }
 0x3af   :  { %928 = shalt.err (%p1096_p8)  }
 0x3b0   :  { %930 = vsyncmov [#allocation2 + $0x7c] }
 0x3b3   :  { %s931_s21 = vpop.sfrf %930 }
 0x3b4   :  { %p1097_p9 = scmp.ne.s32.totalorder %s931_s21, 0 }
 0x3b6   :  { %935 = shalt.err (%p1097_p9)  }
 0x3b7   :  { %937 = vsyncmov [#allocation2 + $0x7d] }
 0x3ba   :  { %s938_s22 = vpop.sfrf %937 }
 0x3bb   :  { %p1098_p10 = scmp.ne.s32.totalorder %s938_s22, 0 }
 0x3bd   :  { %942 = shalt.err (%p1098_p10)  }
 0x3be   :  { %944 = vsyncmov [#allocation2 + $0x7e] }
 0x3c1   :  { %s945_s23 = vpop.sfrf %944 }
 0x3c2   :  { %p1099_p11 = scmp.ne.s32.totalorder %s945_s23, 0 }
 0x3c4   :  { %949 = shalt.err (%p1099_p11)  }
 0x3c5   :  { %951 = vsyncmov [#allocation2 + $0x7f] }
 0x3c8   :  { %s952_s0 = vpop.sfrf %951 }
 0x3c9   :  { %p1100_p12 = scmp.ne.s32.totalorder %s952_s0, 0 }
 0x3cb   :  { %956 = shalt.err (%p1100_p12)  }

</bundles_post_ra>
